<compile_context>
chip_gen: v5e
topology: v5e:2x2
jax: 0.10.0
libtpu: 0.0.40
codegen_flags: <defaults>
</compile_context>

<pallas_src>
import math

import jax
import jax.numpy as jnp
from jax.experimental import pallas as pl
from jax.experimental.pallas import tpu as pltpu


# ----------------------------- Pallas kernel ------------------------------ #

def _layer_norm(h, gamma, beta, eps=1e-5):
    mu = jnp.mean(h, axis=-1, keepdims=True)
    var = jnp.mean((h - mu) * (h - mu), axis=-1, keepdims=True)
    return (h - mu) * jax.lax.rsqrt(var + eps) * gamma + beta


def _mish(h):
    # mish(x) = x * tanh(softplus(x)) = x * n/(n+2) with n = e*(e+2), e = exp(x).
    # Clamp the exp argument at 30 (ratio is already 1.0 in f32 beyond that) to
    # avoid inf/inf; the multiply uses the un-clamped h.
    e = jnp.exp(jnp.minimum(h, 30.0))
    n = e * (e + 2.0)
    return h * (n / (n + 2.0))


def bio_to_quantum_kernel(x_ref,
                          w1_ref, w2_ref, w3_ref,
                          lnv_ref,      # (6, hidden): b1, g1, be1, b2, g2, be2
                          b3_ref,       # (1, 2*quantum_dim)
                          out_ref):     # (tile_b, 2*quantum_dim) normalized qp
    x = x_ref[...]

    # Linear -> LayerNorm -> Mish   (block 1)
    h = jnp.dot(x, w1_ref[...], preferred_element_type=jnp.float32) + lnv_ref[0:1, :]
    h = _mish(_layer_norm(h, lnv_ref[1:2, :], lnv_ref[2:3, :]))

    # Linear -> LayerNorm -> Mish   (block 2)
    h = jnp.dot(h, w2_ref[...], preferred_element_type=jnp.float32) + lnv_ref[3:4, :]
    h = _mish(_layer_norm(h, lnv_ref[4:5, :], lnv_ref[5:6, :]))

    # Final Linear -> (tile_b, 2*Q) quantum parameters
    qp = jnp.dot(h, w3_ref[...], preferred_element_type=jnp.float32) + b3_ref[...]

    # ||complex(real, imag)||_2 per row == sqrt(sum(qp^2)); guard norm > 1e-8
    # is equivalent to sumsq > 1e-16.  Single rsqrt, then a VPU multiply.
    sumsq = jnp.sum(qp * qp, axis=-1, keepdims=True)
    inv = jnp.where(sumsq > 1e-16, jax.lax.rsqrt(sumsq), jnp.ones_like(sumsq))
    out_ref[...] = qp * inv


# ------------------------------ JAX wrapper -------------------------------- #

def init_params(key, bio_dim, quantum_dim, hidden_dim):
    """Kaiming-normal-style weights, zero biases, ones/zeros for LayerNorm —
    matching initialize_weights().  Per-layer vectors are packed."""
    def kaiming(k, fan_in, fan_out):
        std = math.sqrt(2.0 / fan_in)
        return std * jax.random.normal(k, (fan_in, fan_out), jnp.float32)

    k1, k2, k3 = jax.random.split(key, 3)
    # rows: b1, g1, be1, b2, g2, be2
    lnv = jnp.stack([
        jnp.zeros((hidden_dim,), jnp.float32),   # b1
        jnp.ones((hidden_dim,), jnp.float32),    # g1
        jnp.zeros((hidden_dim,), jnp.float32),   # be1
        jnp.zeros((hidden_dim,), jnp.float32),   # b2
        jnp.ones((hidden_dim,), jnp.float32),    # g2
        jnp.zeros((hidden_dim,), jnp.float32),   # be2
    ])
    return dict(
        w1=kaiming(k1, bio_dim, hidden_dim),
        w2=kaiming(k2, hidden_dim, hidden_dim),
        w3=kaiming(k3, hidden_dim, quantum_dim * 2),
        lnv=lnv,
        b3=jnp.zeros((1, quantum_dim * 2), jnp.float32),
    )


def _pick_tile_b(B):
    """Largest power-of-two batch tile (<=1024, multiple of 8) dividing B,
    else the full batch (block == full dim satisfies the (8,128) rule)."""
    for cand in (1024, 512, 256, 128, 64, 32, 16, 8):
        if B % cand == 0 and B >= cand:
            return cand
    return B


def balanced_bio_entropic_bridge_forward(bio_state, params, quantum_dim, tile_b=None):
    """Returns (quantum_state: complex64 (B, Q), uncertainty: float)."""
    B, bio_dim = bio_state.shape
    hidden_dim = params["w1"].shape[1]
    two_q = 2 * quantum_dim

    if tile_b is None:
        tile_b = _pick_tile_b(B)
    assert tile_b == B or (tile_b % 8 == 0 and B % tile_b == 0)

    grid = (pl.cdiv(B, tile_b),)

    def const_spec(shape):
        return pl.BlockSpec(shape, lambda i: (0, 0))

    qp_norm = pl.pallas_call(
        bio_to_quantum_kernel,
        out_shape=jax.ShapeDtypeStruct((B, two_q), jnp.float32),
        grid=grid,
        in_specs=[
            pl.BlockSpec((tile_b, bio_dim), lambda i: (i, 0)),   # bio_state tile
            const_spec(params["w1"].shape),                      # weights stay resident
            const_spec(params["w2"].shape),
            const_spec(params["w3"].shape),
            const_spec((6, hidden_dim)),                         # packed LN/bias vecs
            const_spec((1, two_q)),                              # b3
        ],
        out_specs=pl.BlockSpec((tile_b, two_q), lambda i: (i, 0)),
        compiler_params=pltpu.CompilerParams(
            dimension_semantics=("parallel",)),
    )(bio_state, params["w1"], params["w2"], params["w3"],
      params["lnv"], params["b3"])

    # Lane split + complexification is free layout work in the XLA wrapper.
    real = qp_norm[:, :quantum_dim]
    imag = qp_norm[:, quantum_dim:]
    quantum_state = jax.lax.complex(real, imag)

    # measure_uncertainty: rank-1, trace-normalized density matrix -> exactly
    # one valid eigenvalue -> max_entropy = 0 -> the PyTorch code returns 0.5.
    uncertainty = 0.5
    return quantum_state, uncertainty


# ------------------------------ reference ---------------------------------- #

def _reference_forward(bio_state, params, quantum_dim):
    def ln(h, g, b):
        mu = jnp.mean(h, axis=-1, keepdims=True)
        var = jnp.mean((h - mu) ** 2, axis=-1, keepdims=True)
        return (h - mu) / jnp.sqrt(var + 1e-5) * g + b

    def mish(h):
        return h * jnp.tanh(jax.nn.softplus(h))

    lnv = params["lnv"]
    b1, g1, be1, b2, g2, be2 = (lnv[i] for i in range(6))

    h = bio_state @ params["w1"] + b1
    h = mish(ln(h, g1, be1))
    h = h @ params["w2"] + b2
    h = mish(ln(h, g2, be2))
    qp = h @ params["w3"] + params["b3"]
    real, imag = qp[:, :quantum_dim], qp[:, quantum_dim:]
    norm = jnp.sqrt(jnp.sum(real ** 2 + imag ** 2, axis=-1, keepdims=True))
    norm = jnp.where(norm > 1e-8, norm, jnp.ones_like(norm))
    return jax.lax.complex(real / norm, imag / norm)


# --------------------------------- main ------------------------------------ #

if __name__ == "__main__":
    bio_dim, quantum_dim, hidden_dim = 16, 8, 32

    key = jax.random.PRNGKey(0)
    k_params, k_small, k_big = jax.random.split(key, 3)
    params = init_params(k_params, bio_dim, quantum_dim, hidden_dim)

    # Small-shape check (batch=2 -> single full-array block, grid=(1,)).
    bio_small = jax.random.normal(k_small, (2, bio_dim), jnp.float32)
    qs, uncertainty = balanced_bio_entropic_bridge_forward(
        bio_small, params, quantum_dim)
    qs = jax.block_until_ready(qs)
    ref = _reference_forward(bio_small, params, quantum_dim)
    assert qs.shape == (2, quantum_dim)
    assert qs.dtype == jnp.complex64
    assert jnp.allclose(qs, ref, atol=3e-5, rtol=1e-5)
    assert uncertainty == 0.5

    # Larger-batch check exercising the gridded / pipelined path (grid=(4,)).
    bio_big = jax.random.normal(k_big, (512, bio_dim), jnp.float32)
    qs_big, _ = balanced_bio_entropic_bridge_forward(
        bio_big, params, quantum_dim, tile_b=128)
    qs_big = jax.block_until_ready(qs_big)
    ref_big = _reference_forward(bio_big, params, quantum_dim)
    assert qs_big.shape == (512, quantum_dim)
    assert jnp.allclose(qs_big, ref_big, atol=3e-5, rtol=1e-5)

    print("KERNEL_OK")
</pallas_src>

<mosaic_0001>
module attributes {stable_mosaic.version = 11 : i64} {
  func.func @bio_to_quantum_kernel(%arg0: i32, %arg1: memref<2x16xf32, #tpu.memory_space<vmem>>, %arg2: memref<16x32xf32, #tpu.memory_space<vmem>>, %arg3: memref<32x32xf32, #tpu.memory_space<vmem>>, %arg4: memref<32x16xf32, #tpu.memory_space<vmem>>, %arg5: memref<6x32xf32, #tpu.memory_space<vmem>>, %arg6: memref<1x16xf32, #tpu.memory_space<vmem>>, %arg7: memref<2x16xf32, #tpu.memory_space<vmem>>) attributes {dimension_semantics = [#tpu.dimension_semantics<parallel>], iteration_bounds = array<i64: 1>, scalar_prefetch = 0 : i64, scratch_operands = 0 : i64, tpu.core_type = #tpu.core_type<tc>, window_params = [{transform_indices = @transform_0, window_bounds = array<i64: 2, 16>}, {pipeline_mode = #tpu.pipeline_mode<synchronous>, transform_indices = @transform_1, window_bounds = array<i64: 16, 32>}, {pipeline_mode = #tpu.pipeline_mode<synchronous>, transform_indices = @transform_2, window_bounds = array<i64: 32, 32>}, {pipeline_mode = #tpu.pipeline_mode<synchronous>, transform_indices = @transform_3, window_bounds = array<i64: 32, 16>}, {pipeline_mode = #tpu.pipeline_mode<synchronous>, transform_indices = @transform_4, window_bounds = array<i64: 6, 32>}, {pipeline_mode = #tpu.pipeline_mode<synchronous>, transform_indices = @transform_5, window_bounds = array<i64: 1, 16>}, {transform_indices = @transform_6, window_bounds = array<i64: 2, 16>}]} {
    %c0 = arith.constant 0 : index
    %c0_0 = arith.constant 0 : index
    %0 = vector.load %arg1[%c0, %c0_0] : memref<2x16xf32, #tpu.memory_space<vmem>>, vector<2x16xf32>
    %c0_1 = arith.constant 0 : index
    %c0_2 = arith.constant 0 : index
    %1 = vector.load %arg2[%c0_1, %c0_2] : memref<16x32xf32, #tpu.memory_space<vmem>>, vector<16x32xf32>
    %cst = arith.constant dense<0.000000e+00> : vector<2x32xf32>
    %2 = tpu.matmul %0, %1, %cst {dimension_numbers = #tpu.dot_dimension_numbers<[1], [0], [0], [1], [0, 0, 1, 1], [], []>} : vector<2x16xf32>, vector<16x32xf32>, vector<2x32xf32> -> vector<2x32xf32>
    %c0_3 = arith.constant 0 : index
    %c0_4 = arith.constant 0 : index
    %3 = vector.load %arg5[%c0_3, %c0_4] : memref<6x32xf32, #tpu.memory_space<vmem>>, vector<1x32xf32>
    %4 = vector.broadcast %3 : vector<1x32xf32> to vector<2x32xf32>
    %5 = arith.addf %2, %4 : vector<2x32xf32>
    %c1 = arith.constant 1 : index
    %c0_5 = arith.constant 0 : index
    %6 = vector.load %arg5[%c1, %c0_5] : memref<6x32xf32, #tpu.memory_space<vmem>>, vector<1x32xf32>
    %c2 = arith.constant 2 : index
    %c0_6 = arith.constant 0 : index
    %7 = vector.load %arg5[%c2, %c0_6] : memref<6x32xf32, #tpu.memory_space<vmem>>, vector<1x32xf32>
    %cst_7 = arith.constant dense<0.000000e+00> : vector<2xf32>
    %8 = vector.multi_reduction <add>, %5, %cst_7 [1] : vector<2x32xf32> to vector<2xf32>
    %9 = vector.shape_cast %8 : vector<2xf32> to vector<2x1xf32>
    %cst_8 = arith.constant 3.200000e+01 : f32
    %10 = vector.broadcast %cst_8 : f32 to vector<2x1xf32>
    %11 = arith.divf %9, %10 : vector<2x1xf32>
    %12 = vector.broadcast %11 : vector<2x1xf32> to vector<2x32xf32>
    %13 = arith.subf %5, %12 : vector<2x32xf32>
    %14 = vector.broadcast %11 : vector<2x1xf32> to vector<2x32xf32>
    %15 = arith.subf %5, %14 : vector<2x32xf32>
    %16 = arith.mulf %13, %15 : vector<2x32xf32>
    %cst_9 = arith.constant dense<0.000000e+00> : vector<2xf32>
    %17 = vector.multi_reduction <add>, %16, %cst_9 [1] : vector<2x32xf32> to vector<2xf32>
    %18 = vector.shape_cast %17 : vector<2xf32> to vector<2x1xf32>
    %cst_10 = arith.constant 3.200000e+01 : f32
    %19 = vector.broadcast %cst_10 : f32 to vector<2x1xf32>
    %20 = arith.divf %18, %19 : vector<2x1xf32>
    %21 = vector.broadcast %11 : vector<2x1xf32> to vector<2x32xf32>
    %22 = arith.subf %5, %21 : vector<2x32xf32>
    %cst_11 = arith.constant 9.99999974E-6 : f32
    %23 = vector.broadcast %cst_11 : f32 to vector<2x1xf32>
    %24 = arith.addf %20, %23 : vector<2x1xf32>
    %25 = math.rsqrt %24 : vector<2x1xf32>
    %26 = vector.broadcast %25 : vector<2x1xf32> to vector<2x32xf32>
    %27 = arith.mulf %22, %26 : vector<2x32xf32>
    %28 = vector.broadcast %6 : vector<1x32xf32> to vector<2x32xf32>
    %29 = arith.mulf %27, %28 : vector<2x32xf32>
    %30 = vector.broadcast %7 : vector<1x32xf32> to vector<2x32xf32>
    %31 = arith.addf %29, %30 : vector<2x32xf32>
    %cst_12 = arith.constant 3.000000e+01 : f32
    %32 = vector.broadcast %cst_12 : f32 to vector<2x32xf32>
    %33 = arith.minimumf %31, %32 : vector<2x32xf32>
    %34 = math.exp %33 : vector<2x32xf32>
    %cst_13 = arith.constant 2.000000e+00 : f32
    %35 = vector.broadcast %cst_13 : f32 to vector<2x32xf32>
    %36 = arith.addf %34, %35 : vector<2x32xf32>
    %37 = arith.mulf %34, %36 : vector<2x32xf32>
    %cst_14 = arith.constant 2.000000e+00 : f32
    %38 = vector.broadcast %cst_14 : f32 to vector<2x32xf32>
    %39 = arith.addf %37, %38 : vector<2x32xf32>
    %40 = arith.divf %37, %39 : vector<2x32xf32>
    %41 = arith.mulf %31, %40 : vector<2x32xf32>
    %c0_15 = arith.constant 0 : index
    %c0_16 = arith.constant 0 : index
    %42 = vector.load %arg3[%c0_15, %c0_16] : memref<32x32xf32, #tpu.memory_space<vmem>>, vector<32x32xf32>
    %cst_17 = arith.constant dense<0.000000e+00> : vector<2x32xf32>
    %43 = tpu.matmul %41, %42, %cst_17 {dimension_numbers = #tpu.dot_dimension_numbers<[1], [0], [0], [1], [0, 0, 1, 1], [], []>} : vector<2x32xf32>, vector<32x32xf32>, vector<2x32xf32> -> vector<2x32xf32>
    %c3 = arith.constant 3 : index
    %c0_18 = arith.constant 0 : index
    %44 = vector.load %arg5[%c3, %c0_18] : memref<6x32xf32, #tpu.memory_space<vmem>>, vector<1x32xf32>
    %45 = vector.broadcast %44 : vector<1x32xf32> to vector<2x32xf32>
    %46 = arith.addf %43, %45 : vector<2x32xf32>
    %c4 = arith.constant 4 : index
    %c0_19 = arith.constant 0 : index
    %47 = vector.load %arg5[%c4, %c0_19] : memref<6x32xf32, #tpu.memory_space<vmem>>, vector<1x32xf32>
    %c5 = arith.constant 5 : index
    %c0_20 = arith.constant 0 : index
    %48 = vector.load %arg5[%c5, %c0_20] : memref<6x32xf32, #tpu.memory_space<vmem>>, vector<1x32xf32>
    %cst_21 = arith.constant dense<0.000000e+00> : vector<2xf32>
    %49 = vector.multi_reduction <add>, %46, %cst_21 [1] : vector<2x32xf32> to vector<2xf32>
    %50 = vector.shape_cast %49 : vector<2xf32> to vector<2x1xf32>
    %cst_22 = arith.constant 3.200000e+01 : f32
    %51 = vector.broadcast %cst_22 : f32 to vector<2x1xf32>
    %52 = arith.divf %50, %51 : vector<2x1xf32>
    %53 = vector.broadcast %52 : vector<2x1xf32> to vector<2x32xf32>
    %54 = arith.subf %46, %53 : vector<2x32xf32>
    %55 = vector.broadcast %52 : vector<2x1xf32> to vector<2x32xf32>
    %56 = arith.subf %46, %55 : vector<2x32xf32>
    %57 = arith.mulf %54, %56 : vector<2x32xf32>
    %cst_23 = arith.constant dense<0.000000e+00> : vector<2xf32>
    %58 = vector.multi_reduction <add>, %57, %cst_23 [1] : vector<2x32xf32> to vector<2xf32>
    %59 = vector.shape_cast %58 : vector<2xf32> to vector<2x1xf32>
    %cst_24 = arith.constant 3.200000e+01 : f32
    %60 = vector.broadcast %cst_24 : f32 to vector<2x1xf32>
    %61 = arith.divf %59, %60 : vector<2x1xf32>
    %62 = vector.broadcast %52 : vector<2x1xf32> to vector<2x32xf32>
    %63 = arith.subf %46, %62 : vector<2x32xf32>
    %cst_25 = arith.constant 9.99999974E-6 : f32
    %64 = vector.broadcast %cst_25 : f32 to vector<2x1xf32>
    %65 = arith.addf %61, %64 : vector<2x1xf32>
    %66 = math.rsqrt %65 : vector<2x1xf32>
    %67 = vector.broadcast %66 : vector<2x1xf32> to vector<2x32xf32>
    %68 = arith.mulf %63, %67 : vector<2x32xf32>
    %69 = vector.broadcast %47 : vector<1x32xf32> to vector<2x32xf32>
    %70 = arith.mulf %68, %69 : vector<2x32xf32>
    %71 = vector.broadcast %48 : vector<1x32xf32> to vector<2x32xf32>
    %72 = arith.addf %70, %71 : vector<2x32xf32>
    %cst_26 = arith.constant 3.000000e+01 : f32
    %73 = vector.broadcast %cst_26 : f32 to vector<2x32xf32>
    %74 = arith.minimumf %72, %73 : vector<2x32xf32>
    %75 = math.exp %74 : vector<2x32xf32>
    %cst_27 = arith.constant 2.000000e+00 : f32
    %76 = vector.broadcast %cst_27 : f32 to vector<2x32xf32>
    %77 = arith.addf %75, %76 : vector<2x32xf32>
    %78 = arith.mulf %75, %77 : vector<2x32xf32>
    %cst_28 = arith.constant 2.000000e+00 : f32
    %79 = vector.broadcast %cst_28 : f32 to vector<2x32xf32>
    %80 = arith.addf %78, %79 : vector<2x32xf32>
    %81 = arith.divf %78, %80 : vector<2x32xf32>
    %82 = arith.mulf %72, %81 : vector<2x32xf32>
    %c0_29 = arith.constant 0 : index
    %c0_30 = arith.constant 0 : index
    %83 = vector.load %arg4[%c0_29, %c0_30] : memref<32x16xf32, #tpu.memory_space<vmem>>, vector<32x16xf32>
    %cst_31 = arith.constant dense<0.000000e+00> : vector<2x16xf32>
    %84 = tpu.matmul %82, %83, %cst_31 {dimension_numbers = #tpu.dot_dimension_numbers<[1], [0], [0], [1], [0, 0, 1, 1], [], []>} : vector<2x32xf32>, vector<32x16xf32>, vector<2x16xf32> -> vector<2x16xf32>
    %c0_32 = arith.constant 0 : index
    %c0_33 = arith.constant 0 : index
    %85 = vector.load %arg6[%c0_32, %c0_33] : memref<1x16xf32, #tpu.memory_space<vmem>>, vector<1x16xf32>
    %86 = vector.broadcast %85 : vector<1x16xf32> to vector<2x16xf32>
    %87 = arith.addf %84, %86 : vector<2x16xf32>
    %88 = arith.mulf %87, %87 : vector<2x16xf32>
    %cst_34 = arith.constant dense<0.000000e+00> : vector<2xf32>
    %89 = vector.multi_reduction <add>, %88, %cst_34 [1] : vector<2x16xf32> to vector<2xf32>
    %90 = vector.shape_cast %89 : vector<2xf32> to vector<2x1xf32>
    %cst_35 = arith.constant 1.000000e-16 : f32
    %91 = vector.broadcast %cst_35 : f32 to vector<2x1xf32>
    %92 = arith.cmpf ogt, %90, %91 : vector<2x1xf32>
    %93 = math.rsqrt %90 : vector<2x1xf32>
    %cst_36 = arith.constant 1.000000e+00 : f32
    %94 = vector.broadcast %cst_36 : f32 to vector<2x1xf32>
    %95 = arith.select %92, %93, %94 : vector<2x1xi1>, vector<2x1xf32>
    %96 = vector.broadcast %95 : vector<2x1xf32> to vector<2x16xf32>
    %97 = arith.mulf %87, %96 : vector<2x16xf32>
    %c0_37 = arith.constant 0 : index
    %c0_38 = arith.constant 0 : index
    %98 = vector.load %arg7[%c0_37, %c0_38] : memref<2x16xf32, #tpu.memory_space<vmem>>, vector<2x16xf32>
    tpu.vector_store %arg7[%c0_37, %c0_38], %97 {strides = array<i32>} : memref<2x16xf32, #tpu.memory_space<vmem>>, vector<2x16xf32>,
    return
  }
  func.func @transform_0(%arg0: i32) -> (i32, i32) {
    %c0_i32 = arith.constant 0 : i32
    %c0_i32_0 = arith.constant 0 : i32
    return %arg0, %c0_i32 : i32, i32
  }
  func.func @transform_1(%arg0: i32) -> (i32, i32) {
    %c0_i32 = arith.constant 0 : i32
    %c0_i32_0 = arith.constant 0 : i32
    %c0_i32_1 = arith.constant 0 : i32
    return %c0_i32, %c0_i32_0 : i32, i32
  }
  func.func @transform_2(%arg0: i32) -> (i32, i32) {
    %c0_i32 = arith.constant 0 : i32
    %c0_i32_0 = arith.constant 0 : i32
    %c0_i32_1 = arith.constant 0 : i32
    return %c0_i32, %c0_i32_0 : i32, i32
  }
  func.func @transform_3(%arg0: i32) -> (i32, i32) {
    %c0_i32 = arith.constant 0 : i32
    %c0_i32_0 = arith.constant 0 : i32
    %c0_i32_1 = arith.constant 0 : i32
    return %c0_i32, %c0_i32_0 : i32, i32
  }
  func.func @transform_4(%arg0: i32) -> (i32, i32) {
    %c0_i32 = arith.constant 0 : i32
    %c0_i32_0 = arith.constant 0 : i32
    %c0_i32_1 = arith.constant 0 : i32
    return %c0_i32, %c0_i32_0 : i32, i32
  }
  func.func @transform_5(%arg0: i32) -> (i32, i32) {
    %c0_i32 = arith.constant 0 : i32
    %c0_i32_0 = arith.constant 0 : i32
    %c0_i32_1 = arith.constant 0 : i32
    return %c0_i32, %c0_i32_0 : i32, i32
  }
  func.func @transform_6(%arg0: i32) -> (i32, i32) {
    %c0_i32 = arith.constant 0 : i32
    %c0_i32_0 = arith.constant 0 : i32
    return %arg0, %c0_i32 : i32, i32
  }
}

</mosaic_0001>

<bundles_post_ra>
// kernel: tpu_custom_call.1
= control target key start
LH: loop header
LB: loop body
LE: loop exit
PB: predicated region body
PF: predicated region fallthrough
CT: control target
= control target key end

     0   :  { %11 = vsyncpa [#allocation3], 0  ;;  %s490_s0 = inlined_call_operand.hbm [shape: f32[2,16], index: 0, kind: input, shape index: {}]   ;;  %s491_s1 = inlined_call_operand.vmem [shape: f32[16,32], index: 1, kind: input, shape index: {}]   ;;  %s492_s2 = inlined_call_operand.vmem [shape: f32[32,32], index: 2, kind: input, shape index: {}]   ;;  %s493_s3 = inlined_call_operand.vmem [shape: f32[32,16], index: 3, kind: input, shape index: {}]   ;;  %s494_s4 = inlined_call_operand.hbm [shape: f32[6,32], index: 4, kind: input, shape index: {}]   ;;  %s495_s5 = inlined_call_operand.vmem [shape: f32[1,16], index: 5, kind: input, shape index: {}]   ;;  %s496_s6 = inlined_call_operand.hbm [shape: f32[2,16], index: 6, kind: output, shape index: {}]  }
   0x1   :  { %12 = vsyncpa [#allocation6], 0 }
   0x2   :  { %13 = vsyncpa [#allocation4], 0  ;;  %s19_s23 = sshll.u32 %s490_s0, 4  ;;  %s395_s24 = smov [#allocation2]   ;;  %s20_s23 = int_to_ptr.hbm [resolvable:$true] %s19_s23 }
   0x3   :  { %s21_s25 = sshll.u32 %s395_s24, 4  ;;  %s36_s28 = sshll.u32 %s494_s4, 4  ;;  %s22_s25 = int_to_ptr.vmem [resolvable:$true] %s21_s25  ;;  %s37_s28 = int_to_ptr.hbm [resolvable:$true] %s36_s28 }
   0x4   :  { %24 = dma.hbm_to_vmem [thread:$0]  %s20_s23, 32, %s22_s25, [#allocation3]  }
   0x5   :  { %s396_s29 = smov [#allocation5]  }
   0x6   :  { %s38_s30 = sshll.u32 %s396_s29, 4  ;;  %s39_s30 = int_to_ptr.vmem [resolvable:$true] %s38_s30 }
   0x7   :  { %41 = dma.hbm_to_vmem [thread:$0]  %s37_s28, 128, %s39_s30, [#allocation6]  }
   0x8   :  { %389 = dma.done.wait [#allocation3], 32  }
   0x9   :  { %390 = vsyncadd [#allocation3], 4294967264 }
   0xa   :  { %391 = dma.done.wait [#allocation6], 128  }
   0xb   :  { %392 = vsyncadd [#allocation6], 4294967168  ;;  %v54_v0 = vld [vmem:[%s491_s1 + $0x8] sm:$0xff]  ;;  %v53_v1 = vld [vmem:[%s491_s1] sm:$0xff]  ;;  %vm57_vm0 = vcmask 130048   ;;  %vm83_vm1 = vcmask 254976  }
   0xc   :  { %75 = vmatpush.msra.mxu0 %v54_v0  ;;  %v52_v2 = vld [vmem:[#allocation2] sm:$0x3]  ;;  %v294_v3 = vld [vmem:[#allocation5] ss:$0 sm:$0xff]  ;;  %v397_v7 = vmov 32.0   ;;  %v142_v19 = vld [vmem:[%s492_s2 + $0x18] sm:$0xff] }
   0xd   :  { %301 = vrcp.f32 %v397_v7  ;;  %v141_v20 = vld [vmem:[%s492_s2 + $0x10] sm:$0xff]  ;;  %161 = vmatpush.msra.mxu1 %v142_v19  ;;  %v140_v21 = vld [vmem:[%s492_s2 + $0x8] sm:$0xff]  ;;  %v139_v22 = vld [vmem:[%s492_s2] sm:$0xff]  ;;  %vm145_vm10 = vcmask 261120   ;;  %s398_s24 = smov [#allocation7]   ;;  %s276_s27 = sshll.u32 %s496_s6, 4  ;;  %s277_s27 = int_to_ptr.hbm [resolvable:$true] %s276_s27 }
   0xe   :  { %76 = vmatpush.msra.mxu0 %v53_v1  ;;  %v295_v32 = vld [vmem:[#allocation5 + $0x1] ss:$0 sm:$0xff]  ;;  %v296_v35 = vld [vmem:[#allocation5 + $0x2] ss:$0 sm:$0xff]  ;;  %v297_v56 = vld [vmem:[#allocation5 + $0x3] ss:$0 sm:$0xff] }
   0xf   :  { %287 = vmatmul.msk.f32.vlgmr.msra.gmra.mxu0 %vm57_vm0, %v52_v2  ;;  %162 = vmatpush.msra.mxu1 %v141_v20  ;;  %v222_v1 = vld [vmem:[%s493_s3 + $0x18] sm:$0xff]  ;;  %v221_v2 = vld [vmem:[%s493_s3 + $0x10] sm:$0xff] }
  0x10   :  { %242 = vmatpush.msra.mxu2 %v222_v1 }
  0x11   :  { %163 = vmatpush.msra.mxu1 %v140_v21 }
  0x12   :  { %243 = vmatpush.msra.mxu2 %v221_v2 }
  0x13   :  { %v302_v8 = vpop.eup %301  ;;  %164 = vmatpush.msra.mxu1 %v139_v22 }
  0x14   :  { %v88_v9 = vmul.f32 32.0, %v302_v8  ;;  %vm92_vm2 = vweird.f32 %v302_v8 }
  0x16   :  { %v89_v10 = vsub.f32 1.0, %v88_v9 }
  0x18   :  { %v90_v11 = vmul.f32 %v302_v8, %v89_v10 }
  0x1a   :  { %v91_v12 = vadd.f32 %v302_v8, %v90_v11 }
  0x1c   :  { %v447_v13 = vsel %vm92_vm2, %v302_v8, %v91_v12  ;;  %vm251_vm2 = vcmask 123904  }
  0x8c   :  { %v78_v4 = vpop.f32.mrf.mxu0 }
  0x8d   :  { %v79_v5 = vadd.f32 %v294_v3, %v78_v4  ;;  %v220_v3 = vld [vmem:[%s493_s3 + $0x8] sm:$0xff]  ;;  %v219_v4 = vld [vmem:[%s493_s3] sm:$0xff] }
  0x8e   :  { %244 = vmatpush.msra.mxu2 %v220_v3 }
  0x8f   :  { %v84_v6 = vsel %vm83_vm1, %v79_v5, 0.0 }
  0x90   :  { %85 = vadd.xlane.f32.xlu0 %v84_v6  ;;  %245 = vmatpush.msra.mxu2 %v219_v4 }
 0x103   :  { %v86_v14 = vpop.xlane.xlu0 %85 }
 0x104   :  { %v94_v15 = vmul.f32 %v447_v13, %v86_v14 }
 0x106   :  { %v95_v16 = vsub.f32 %v79_v5, %v94_v15  ;;  %v298_v15 = vld [vmem:[#allocation5 + $0x4] ss:$0 sm:$0xff] }
 0x108   :  { %v96_v17 = vmul.f32 %v95_v16, %v95_v16 }
 0x10a   :  { %v97_v18 = vsel %vm83_vm1, %v96_v17, 0.0 }
 0x10b   :  { %98 = vadd.xlane.f32.xlu0 %v97_v18  ;;  %v299_v18 = vld [vmem:[#allocation5 + $0x5] ss:$0 sm:$0xff] }
 0x17e   :  { %v99_v23 = vpop.xlane.xlu0 %98 }
 0x17f   :  { %v100_v24 = vmul.f32 %v99_v23, %v447_v13 }
 0x181   :  { %v101_v25 = vadd.f32 1e-05, %v100_v24 }
 0x183   :  { %303 = vrsqrt.f32 %v101_v25  ;;  %vm108_vm4 = vweird.f32 %v101_v25 }
 0x189   :  { %v304_v26 = vpop.eup %303 }
 0x18a   :  { %v103_v27 = vmul.f32 %v304_v26, %v101_v25  ;;  %vm109_vm3 = vweird.f32 %v304_v26 }
 0x18b   :  { %vm110_vm5 = vmor %vm108_vm4, %vm109_vm3 }
 0x18c   :  { %v104_v28 = vmul.f32 %v304_v26, %v103_v27 }
 0x18e   :  { %v105_v29 = vmul.f32 0.5, %v104_v28 }
 0x190   :  { %v106_v30 = vsub.f32 1.5, %v105_v29 }
 0x192   :  { %v107_v31 = vmul.f32 %v304_v26, %v106_v30 }
 0x194   :  { %v111_v33 = vsel %vm110_vm5, %v304_v26, %v107_v31 }
 0x195   :  { %v112_v34 = vmul.f32 %v111_v33, %v95_v16 }
 0x197   :  { %v114_v36 = vmul.f32 %v295_v32, %v112_v34 }
 0x199   :  { %v116_v37 = vadd.f32 %v296_v35, %v114_v36 }
 0x19b   :  { %v117_v38 = vmin.f32 %v116_v37, 30.0 }
 0x19d   :  { %v118_v39 = vmul.f32 1.442695, %v117_v38  ;;  %v300_v38 = vld [vmem:[%s495_s5] ss:$0 sm:$0xff]  ;;  %s274_s5 = sshll.u32 %s398_s24, 4  ;;  %s275_s5 = int_to_ptr.vmem [resolvable:$true] %s274_s5 }
 0x19f   :  { %305 = vpow2.f32 %v118_v39 }
 0x1a5   :  { %v306_v40 = vpop.eup %305 }
 0x1a6   :  { %v120_v41 = vadd.f32 2.0, %v306_v40 }
 0x1a8   :  { %v121_v42 = vmul.f32 %v306_v40, %v120_v41 }
 0x1aa   :  { %v122_v43 = vadd.f32 2.0, %v121_v42 }
 0x1ac   :  { %307 = vrcp.f32 %v122_v43  ;;  %v134_v47 = vand.u32 2147483648, %v122_v43  ;;  %v132_v49 = vand.u32 2147483647, %v122_v43  ;;  %vm128_vm7 = vweird.f32 %v122_v43 }
 0x1ae   :  { %v135_v51 = vor.u32 1.1754944e-38, %v134_v47  ;;  %vm133_vm9 = vcmp.eq.f32.partialorder %v132_v49, 8.507059e+37 }
 0x1b2   :  { %v308_v44 = vpop.eup %307 }
 0x1b3   :  { %v124_v45 = vmul.f32 %v308_v44, %v122_v43  ;;  %vm129_vm6 = vweird.f32 %v308_v44 }
 0x1b4   :  { %vm130_vm8 = vmor %vm128_vm7, %vm129_vm6 }
 0x1b5   :  { %v125_v46 = vsub.f32 1.0, %v124_v45 }
 0x1b7   :  { %v126_v48 = vmul.f32 %v308_v44, %v125_v46 }
 0x1b9   :  { %v127_v50 = vadd.f32 %v308_v44, %v126_v48 }
 0x1bb   :  { %v131_v52 = vsel %vm130_vm8, %v308_v44, %v127_v50 }
 0x1bc   :  { %v136_v53 = vsel %vm133_vm9, %v135_v51, %v131_v52 }
 0x1bd   :  { %v137_v54 = vmul.f32 %v136_v53, %v121_v42 }
 0x1bf   :  { %v138_v55 = vmul.f32 %v137_v54, %v116_v37 }
 0x1c1   :  { %288 = vmatmul.msk.f32.vlgmr.msra.gmra.mxu1 %vm145_vm10, %v138_v55 }
 0x23e   :  { %v166_v57 = vpop.f32.mrf.mxu1 }
 0x23f   :  { %v167_v58 = vadd.f32 %v297_v56, %v166_v57 }
 0x241   :  { %v171_v59 = vsel %vm83_vm1, %v167_v58, 0.0 }
 0x242   :  { %172 = vadd.xlane.f32.xlu1 %v171_v59 }
 0x2b5   :  { %v173_v60 = vpop.xlane.xlu1 %172 }
 0x2b6   :  { %v174_v61 = vmul.f32 %v173_v60, %v447_v13 }
 0x2b8   :  { %v175_v62 = vsub.f32 %v167_v58, %v174_v61 }
 0x2ba   :  { %v176_v63 = vmul.f32 %v175_v62, %v175_v62 }
 0x2bc   :  { %v177_v0 = vsel %vm83_vm1, %v176_v63, 0.0 }
 0x2bd   :  { %178 = vadd.xlane.f32.xlu1 %v177_v0 }
 0x330   :  { %v179_v5 = vpop.xlane.xlu1 %178 }
 0x331   :  { %v180_v6 = vmul.f32 %v179_v5, %v447_v13 }
 0x333   :  { %v181_v7 = vadd.f32 1e-05, %v180_v6 }
 0x335   :  { %309 = vrsqrt.f32 %v181_v7  ;;  %vm188_vm12 = vweird.f32 %v181_v7 }
 0x33b   :  { %v310_v8 = vpop.eup %309 }
 0x33c   :  { %v183_v9 = vmul.f32 %v310_v8, %v181_v7  ;;  %vm189_vm11 = vweird.f32 %v310_v8 }
 0x33d   :  { %vm190_vm13 = vmor %vm188_vm12, %vm189_vm11 }
 0x33e   :  { %v184_v10 = vmul.f32 %v310_v8, %v183_v9 }
 0x340   :  { %v185_v11 = vmul.f32 0.5, %v184_v10 }
 0x342   :  { %v186_v12 = vsub.f32 1.5, %v185_v11 }
 0x344   :  { %v187_v14 = vmul.f32 %v310_v8, %v186_v12 }
 0x346   :  { %v191_v16 = vsel %vm190_vm13, %v310_v8, %v187_v14 }
 0x347   :  { %v192_v17 = vmul.f32 %v191_v16, %v175_v62 }
 0x349   :  { %v194_v19 = vmul.f32 %v298_v15, %v192_v17 }
 0x34b   :  { %v196_v20 = vadd.f32 %v299_v18, %v194_v19 }
 0x34d   :  { %v197_v21 = vmin.f32 %v196_v20, 30.0 }
 0x34f   :  { %v198_v22 = vmul.f32 1.442695, %v197_v21 }
 0x351   :  { %311 = vpow2.f32 %v198_v22 }
 0x357   :  { %v312_v13 = vpop.eup %311 }
 0x358   :  { %v200_v23 = vadd.f32 2.0, %v312_v13 }
 0x35a   :  { %v201_v24 = vmul.f32 %v312_v13, %v200_v23 }
 0x35c   :  { %v202_v25 = vadd.f32 2.0, %v201_v24 }
 0x35e   :  { %313 = vrcp.f32 %v202_v25  ;;  %v214_v29 = vand.u32 2147483648, %v202_v25  ;;  %v212_v31 = vand.u32 2147483647, %v202_v25  ;;  %vm208_vm15 = vweird.f32 %v202_v25 }
 0x360   :  { %v215_v33 = vor.u32 1.1754944e-38, %v214_v29  ;;  %vm213_vm1 = vcmp.eq.f32.partialorder %v212_v31, 8.507059e+37 }
 0x364   :  { %v314_v26 = vpop.eup %313 }
 0x365   :  { %v204_v27 = vmul.f32 %v314_v26, %v202_v25  ;;  %vm209_vm14 = vweird.f32 %v314_v26 }
 0x366   :  { %vm210_vm0 = vmor %vm208_vm15, %vm209_vm14 }
 0x367   :  { %v205_v28 = vsub.f32 1.0, %v204_v27 }
 0x369   :  { %v206_v30 = vmul.f32 %v314_v26, %v205_v28 }
 0x36b   :  { %v207_v32 = vadd.f32 %v314_v26, %v206_v30 }
 0x36d   :  { %v211_v34 = vsel %vm210_vm0, %v314_v26, %v207_v32 }
 0x36e   :  { %v216_v35 = vsel %vm213_vm1, %v215_v33, %v211_v34 }
 0x36f   :  { %v217_v36 = vmul.f32 %v216_v35, %v201_v24 }
 0x371   :  { %v218_v37 = vmul.f32 %v217_v36, %v196_v20 }
 0x373   :  { %289 = vmatmul.msk.f32.vlgmr.msra.gmra.mxu2 %vm145_vm10, %v218_v37 }
 0x3f6   :  { %v247_v39 = vpop.f32.mrf.mxu2 }
 0x3f7   :  { %v248_v40 = vadd.f32 %v300_v38, %v247_v39 }
 0x3f9   :  { %v250_v41 = vmul.f32 %v248_v40, %v248_v40 }
 0x3fb   :  { %v252_v42 = vsel %vm251_vm2, %v250_v41, 0.0 }
 0x3fc   :  { %253 = vadd.xlane.f32.xlu2 %v252_v42 }
 0x46f   :  { %v254_v43 = vpop.xlane.xlu2 %253 }
 0x470   :  { %315 = vrsqrt.f32 %v254_v43  ;;  %vm262_vm4 = vweird.f32 %v254_v43  ;;  %vm255_vm6 = vcmp.gt.f32.partialorder %v254_v43, 1e-16 }
 0x476   :  { %v316_v44 = vpop.eup %315 }
 0x477   :  { %v257_v45 = vmul.f32 %v316_v44, %v254_v43  ;;  %vm263_vm3 = vweird.f32 %v316_v44 }
 0x478   :  { %vm264_vm5 = vmor %vm262_vm4, %vm263_vm3 }
 0x479   :  { %v258_v46 = vmul.f32 %v316_v44, %v257_v45 }
 0x47b   :  { %v259_v47 = vmul.f32 0.5, %v258_v46 }
 0x47d   :  { %v260_v48 = vsub.f32 1.5, %v259_v47 }
 0x47f   :  { %v261_v49 = vmul.f32 %v316_v44, %v260_v48 }
 0x481   :  { %v265_v50 = vsel %vm264_vm5, %v316_v44, %v261_v49 }
 0x482   :  { %v266_v51 = vsel %vm255_vm6, %v265_v50, 1.0 }
 0x483   :  { %v267_v52 = vmul.f32 %v266_v51, %v248_v40 }
 0x485   :  { %268 = vst.msk [vmem:[#allocation7] sm:$0x3] %vm251_vm2, %v267_v52 }
 0x486   :  { %279 = dma.vmem_to_hbm [thread:$0]  %s275_s5, 32, %s277_s27, [#allocation4]  }
 0x487   :  { %393 = dma.done.wait [#allocation4], 32  }
 0x488   :  { %394 = vsyncadd [#allocation4], 4294967264 }
 0x489   :  { %284 = vsyncpa [#allocation3], 1 }
 0x48a   :  { %285 = vsyncpa [#allocation6], 1 }
 0x48b   :  { %286 = vsyncpa [#allocation4], 1 }

</bundles_post_ra>
